<compile_context>
chip_gen: v7x
topology: tpu7x:2x2x1
jax: 0.10.0
libtpu: 0.0.40
codegen_flags: <defaults>
</compile_context>

<pallas_src>
import functools

import jax
import jax.numpy as jnp
from jax.experimental import pallas as pl
from jax.experimental.pallas import tpu as pltpu  # noqa: F401  (kept for TPU-specific extensions)


# ---------------------------------------------------------------------------
# Pallas kernels
# ---------------------------------------------------------------------------

def _conv_mm_kernel(w_ref, pats_ref, shift_ref, o_ref):
    """o = relu(W @ pats + shift).  W has the BN/bias scale pre-folded.

    w_ref:    (Cout, Cin*9)  bf16
    pats_ref: (Cin*9, B*H*W) bf16   (lane-dense output columns)
    shift_ref:(Cout, 1)      f32
    o_ref:    (Cout, B*H*W)  f32
    """
    y = jnp.dot(w_ref[...], pats_ref[...], preferred_element_type=jnp.float32)
    o_ref[...] = jnp.maximum(y + shift_ref[...], 0.0)


def _bilstm_embed_kernel(x_ref, wih_ref, whh_ref, b_ref, wemb_ref, bemb_ref,
                         o_ref, *, T, B, H):
    """Fused bidirectional LSTM + linear embedding + log_softmax.

    x_ref:    (T*B, In)                rows ordered t-major, b-minor
    wih_ref:  (In, 8H)                 cols [fwd i,f,g,o | bwd i,f,g,o]
    whh_ref:  (2H, 8H)                 block-diagonal [[Whh_f, 0], [0, Whh_b]]
    b_ref:    (1, 8H)                  b_ih + b_hh, both directions
    wemb_ref: (2H, n_out), bemb_ref: (1, n_out)
    o_ref:    (T*B, n_out)             log_softmax output
    """
    # Hoisted input projection for BOTH directions in one well-shaped matmul.
    gates_in = jnp.dot(x_ref[...], wih_ref[...],
                       preferred_element_type=jnp.float32) + b_ref[...]

    h = jnp.zeros((B, 2 * H), jnp.float32)   # [h_fwd | h_bwd]
    c = jnp.zeros((B, 2 * H), jnp.float32)
    hs = []
    for s in range(T):  # fully unrolled: T is small & static (LLO visibility)
        # forward consumes time s, backward consumes time T-1-s
        g_in = jnp.concatenate(
            [gates_in[s * B:(s + 1) * B, 0:4 * H],
             gates_in[(T - 1 - s) * B:(T - s) * B, 4 * H:8 * H]], axis=1)
        # single block-diagonal recurrent matmul drives both directions
        gates = g_in + jnp.dot(h, whh_ref[...],
                               preferred_element_type=jnp.float32)  # (B, 8H)
        sig = jax.nn.sigmoid(gates)   # one full-width EUP pass
        tnh = jnp.tanh(gates)         # one full-width EUP pass
        # PyTorch gate order per direction: i, f, g, o
        i_g = jnp.concatenate([sig[:, 0 * H:1 * H], sig[:, 4 * H:5 * H]], axis=1)
        f_g = jnp.concatenate([sig[:, 1 * H:2 * H], sig[:, 5 * H:6 * H]], axis=1)
        g_g = jnp.concatenate([tnh[:, 2 * H:3 * H], tnh[:, 6 * H:7 * H]], axis=1)
        o_g = jnp.concatenate([sig[:, 3 * H:4 * H], sig[:, 7 * H:8 * H]], axis=1)
        c = f_g * c + i_g * g_g
        h = o_g * jnp.tanh(c)
        hs.append(h)

    # rec[t] = [h_fwd(t) | h_bwd(t)]; backward step s produced time T-1-s.
    rec = jnp.concatenate(
        [jnp.concatenate([hs[t][:, 0:H], hs[T - 1 - t][:, H:2 * H]], axis=1)
         for t in range(T)], axis=0)                       # (T*B, 2H)

    emb = jnp.dot(rec, wemb_ref[...],
                  preferred_element_type=jnp.float32) + bemb_ref[...]
    m = jnp.max(emb, axis=-1, keepdims=True)
    lse = m + jnp.log(jnp.sum(jnp.exp(emb - m), axis=-1, keepdims=True))
    o_ref[...] = emb - lse


# ---------------------------------------------------------------------------
# Python wrappers (thin XLA glue: pad, im2col patches, maxpool, layout plumbing)
# ---------------------------------------------------------------------------

def conv3x3_bn_relu(x_cbhw, w_mat, shift):
    """3x3 conv (stride 1, pad 1) + folded BN/bias shift + ReLU, CBHW layout.

    x_cbhw: (Cin, B, H, W);  w_mat: (Cout, Cin*9) bf16 (scale folded);
    shift: (Cout, 1) f32.  Returns (Cout, B, H, W) f32.
    """
    Cin, B, H, W = x_cbhw.shape
    Cout = w_mat.shape[0]
    # TODO(synk): im2col patch extraction kept as XLA glue (cast to bf16);
    # building patches in-kernel from the padded input would remove the 9x
    # HBM expansion at realistic sizes.
    xp = jnp.pad(x_cbhw, ((0, 0), (0, 0), (1, 1), (1, 1)))
    pats = jnp.stack([xp[:, :, i:i + H, j:j + W]
                      for i in range(3) for j in range(3)], axis=1)  # (Cin,9,B,H,W)
    pats = pats.reshape(Cin * 9, B * H * W).astype(jnp.bfloat16)

    # TODO(synk): at larger B/W add a grid over the B*H*W column dim with
    # 512+ wide tiles + dimension_semantics; whole-array blocks are fine here.
    out = pl.pallas_call(
        _conv_mm_kernel,
        out_shape=jax.ShapeDtypeStruct((Cout, B * H * W), jnp.float32),
    )(w_mat, pats, shift)
    return out.reshape(Cout, B, H, W)


def maxpool2x2_cbhw(x):
    # TODO(synk): MaxPool2d(2,2) kept as XLA glue (memory-bound, tiny).
    C, B, H, W = x.shape
    return x.reshape(C, B, H // 2, 2, W // 2, 2).max(axis=(3, 5))


def bilstm_embed_log_softmax(seq, kp):
    """seq: (T, B, In) -> (T, B, n_out) log-probabilities."""
    T, B, In = seq.shape
    H = kp["whh_blk"].shape[0] // 2
    n_out = kp["emb_wT"].shape[1]
    x_flat = seq.reshape(T * B, In)
    kernel = functools.partial(_bilstm_embed_kernel, T=T, B=B, H=H)
    y = pl.pallas_call(
        kernel,
        out_shape=jax.ShapeDtypeStruct((T * B, n_out), jnp.float32),
    )(x_flat, kp["wih_cat"], kp["whh_blk"], kp["b_cat"],
      kp["emb_wT"], kp["emb_bT"])
    return y.reshape(T, B, n_out)


def rcnn_forward(x, kp):
    """RCNN.forward: conv feature extractor -> squeeze/permute -> BLSTM ->
    linear embedding -> log_softmax(dim=2)."""
    h = jnp.transpose(x, (1, 0, 2, 3))                    # NCHW -> CBHW (once)
    for k in range(3):
        h = conv3x3_bn_relu(h, kp[f"conv{k}_wmat"], kp[f"conv{k}_shift"])
        h = maxpool2x2_cbhw(h)

    C, B, Hh, W = h.shape
    assert Hh == 1, f"the height of conv must be 1, and is {Hh}"
    seq = jnp.transpose(h[:, :, 0, :], (2, 1, 0))         # (T=W, B, C)

    return bilstm_embed_log_softmax(seq, kp)              # (T, B, n_out)


# ---------------------------------------------------------------------------
# Deterministic parameter construction (PyTorch-layout) + kernel-layout prep.
# ---------------------------------------------------------------------------

def make_params(key):
    n_conv_out = [8, 16, 32]
    batch_norm = [True, False, True]
    n_hidden = 32
    n_r_input = 32
    n_out = 16
    eps = 1e-5

    p = {}
    keys = iter(jax.random.split(key, 64))

    n_in = 1
    for k in range(3):
        cout = n_conv_out[k]
        w = 0.1 * jax.random.normal(next(keys), (cout, n_in, 3, 3), jnp.float32)
        b = 0.1 * jax.random.normal(next(keys), (cout,), jnp.float32)
        if batch_norm[k]:
            gamma = 1.0 + 0.1 * jax.random.normal(next(keys), (cout,), jnp.float32)
            beta = 0.1 * jax.random.normal(next(keys), (cout,), jnp.float32)
            mean = 0.1 * jax.random.normal(next(keys), (cout,), jnp.float32)
            var = 1.0 + 0.1 * jnp.abs(jax.random.normal(next(keys), (cout,), jnp.float32))
            scale = gamma / jnp.sqrt(var + eps)
            shift = (b - mean) * scale + beta
        else:
            scale = jnp.ones((cout,), jnp.float32)
            shift = b
        p[f"conv{k}_w"] = w
        p[f"conv{k}_scale"] = scale
        p[f"conv{k}_shift"] = shift
        n_in = cout

    for d in ("f", "b"):
        p[f"w_ih_{d}"] = 0.1 * jax.random.normal(next(keys), (4 * n_hidden, n_r_input), jnp.float32)
        p[f"w_hh_{d}"] = 0.1 * jax.random.normal(next(keys), (4 * n_hidden, n_hidden), jnp.float32)
        p[f"b_ih_{d}"] = 0.1 * jax.random.normal(next(keys), (4 * n_hidden,), jnp.float32)
        p[f"b_hh_{d}"] = 0.1 * jax.random.normal(next(keys), (4 * n_hidden,), jnp.float32)

    p["emb_w"] = 0.1 * jax.random.normal(next(keys), (n_out, 2 * n_hidden), jnp.float32)
    p["emb_b"] = 0.1 * jax.random.normal(next(keys), (n_out,), jnp.float32)
    return p


def prepare_params(p, n_hidden=32):
    """Fold BN scale into conv weights and repack into kernel-friendly layouts."""
    q = {}
    for k in range(3):
        w = p[f"conv{k}_w"]                                # (Cout, Cin, 3, 3)
        scale = p[f"conv{k}_scale"]
        shift = p[f"conv{k}_shift"]
        cout = w.shape[0]
        q[f"conv{k}_wmat"] = (w.reshape(cout, -1) * scale[:, None]).astype(jnp.bfloat16)
        q[f"conv{k}_shift"] = shift.reshape(cout, 1).astype(jnp.float32)

    H = n_hidden
    q["wih_cat"] = jnp.concatenate([p["w_ih_f"].T, p["w_ih_b"].T], axis=1)  # (In, 8H)
    whh_blk = jnp.zeros((2 * H, 8 * H), jnp.float32)
    whh_blk = whh_blk.at[0:H, 0:4 * H].set(p["w_hh_f"].T)
    whh_blk = whh_blk.at[H:2 * H, 4 * H:8 * H].set(p["w_hh_b"].T)
    q["whh_blk"] = whh_blk
    q["b_cat"] = jnp.concatenate([p["b_ih_f"] + p["b_hh_f"],
                                  p["b_ih_b"] + p["b_hh_b"]]).reshape(1, 8 * H)
    q["emb_wT"] = p["emb_w"].T                              # (2H, n_out)
    q["emb_bT"] = p["emb_b"].reshape(1, -1)                 # (1, n_out)
    return q


if __name__ == "__main__":
    key = jax.random.PRNGKey(0)
    k_params, k_x = jax.random.split(key)
    params = make_params(k_params)
    kparams = prepare_params(params)

    # input images: (batch=2, channels=1, height=8, width=32)
    x = jax.random.normal(k_x, (2, 1, 8, 32), jnp.float32)

    out = jax.jit(rcnn_forward)(x, kparams)
    out = jax.block_until_ready(out)
    assert out.shape == (4, 2, 16), out.shape
    # log_softmax rows must sum to 1 in prob space
    assert jnp.allclose(jnp.exp(out).sum(-1), 1.0, atol=1e-4)
    print("KERNEL_OK")
</pallas_src>

<mosaic_0001>
module attributes {stable_mosaic.version = 11 : i64} {
  func.func @_conv_mm_kernel(%arg0: memref<8x9xbf16, #tpu.memory_space<vmem>>, %arg1: memref<9x512xbf16, #tpu.memory_space<vmem>>, %arg2: memref<8x1xf32, #tpu.memory_space<vmem>>, %arg3: memref<8x512xf32, #tpu.memory_space<vmem>>) attributes {dimension_semantics = [], scalar_prefetch = 0 : i64, scratch_operands = 0 : i64, tpu.core_type = #tpu.core_type<tc>} {
    %c0 = arith.constant 0 : index
    %c0_0 = arith.constant 0 : index
    %0 = vector.load %arg0[%c0, %c0_0] : memref<8x9xbf16, #tpu.memory_space<vmem>>, vector<8x9xbf16>
    %c0_1 = arith.constant 0 : index
    %c0_2 = arith.constant 0 : index
    %1 = vector.load %arg1[%c0_1, %c0_2] : memref<9x512xbf16, #tpu.memory_space<vmem>>, vector<9x512xbf16>
    %cst = arith.constant dense<0.000000e+00> : vector<8x512xf32>
    %2 = tpu.matmul %0, %1, %cst {dimension_numbers = #tpu.dot_dimension_numbers<[1], [0], [0], [1], [0, 0, 1, 1], [], []>} : vector<8x9xbf16>, vector<9x512xbf16>, vector<8x512xf32> -> vector<8x512xf32>
    %c0_3 = arith.constant 0 : index
    %c0_4 = arith.constant 0 : index
    %3 = vector.load %arg2[%c0_3, %c0_4] : memref<8x1xf32, #tpu.memory_space<vmem>>, vector<8x1xf32>
    %4 = vector.broadcast %3 : vector<8x1xf32> to vector<8x512xf32>
    %5 = arith.addf %2, %4 : vector<8x512xf32>
    %cst_5 = arith.constant 0.000000e+00 : f32
    %6 = vector.broadcast %cst_5 : f32 to vector<8x512xf32>
    %7 = arith.maximumf %5, %6 : vector<8x512xf32>
    %c0_6 = arith.constant 0 : index
    %c0_7 = arith.constant 0 : index
    %8 = vector.load %arg3[%c0_6, %c0_7] : memref<8x512xf32, #tpu.memory_space<vmem>>, vector<8x512xf32>
    tpu.vector_store %arg3[%c0_6, %c0_7], %7 {strides = array<i32>} : memref<8x512xf32, #tpu.memory_space<vmem>>, vector<8x512xf32>,
    return
  }
}

module attributes {stable_mosaic.version = 11 : i64} {
  func.func @_conv_mm_kernel(%arg0: memref<16x72xbf16, #tpu.memory_space<vmem>>, %arg1: memref<72x128xbf16, #tpu.memory_space<vmem>>, %arg2: memref<16x1xf32, #tpu.memory_space<vmem>>, %arg3: memref<16x128xf32, #tpu.memory_space<vmem>>) attributes {dimension_semantics = [], scalar_prefetch = 0 : i64, scratch_operands = 0 : i64, tpu.core_type = #tpu.core_type<tc>} {
    %c0 = arith.constant 0 : index
    %c0_0 = arith.constant 0 : index
    %0 = vector.load %arg0[%c0, %c0_0] : memref<16x72xbf16, #tpu.memory_space<vmem>>, vector<16x72xbf16>
    %c0_1 = arith.constant 0 : index
    %c0_2 = arith.constant 0 : index
    %1 = vector.load %arg1[%c0_1, %c0_2] : memref<72x128xbf16, #tpu.memory_space<vmem>>, vector<72x128xbf16>
    %cst = arith.constant dense<0.000000e+00> : vector<16x128xf32>
    %2 = tpu.matmul %0, %1, %cst {dimension_numbers = #tpu.dot_dimension_numbers<[1], [0], [0], [1], [0, 0, 1, 1], [], []>} : vector<16x72xbf16>, vector<72x128xbf16>, vector<16x128xf32> -> vector<16x128xf32>
    %c0_3 = arith.constant 0 : index
    %c0_4 = arith.constant 0 : index
    %3 = vector.load %arg2[%c0_3, %c0_4] : memref<16x1xf32, #tpu.memory_space<vmem>>, vector<16x1xf32>
    %4 = vector.broadcast %3 : vector<16x1xf32> to vector<16x128xf32>
    %5 = arith.addf %2, %4 : vector<16x128xf32>
    %cst_5 = arith.constant 0.000000e+00 : f32
    %6 = vector.broadcast %cst_5 : f32 to vector<16x128xf32>
    %7 = arith.maximumf %5, %6 : vector<16x128xf32>
    %c0_6 = arith.constant 0 : index
    %c0_7 = arith.constant 0 : index
    %8 = vector.load %arg3[%c0_6, %c0_7] : memref<16x128xf32, #tpu.memory_space<vmem>>, vector<16x128xf32>
    tpu.vector_store %arg3[%c0_6, %c0_7], %7 {strides = array<i32>} : memref<16x128xf32, #tpu.memory_space<vmem>>, vector<16x128xf32>,
    return
  }
}

module attributes {stable_mosaic.version = 11 : i64} {
  func.func @_conv_mm_kernel(%arg0: memref<32x144xbf16, #tpu.memory_space<vmem>>, %arg1: memref<144x32xbf16, #tpu.memory_space<vmem>>, %arg2: memref<32x1xf32, #tpu.memory_space<vmem>>, %arg3: memref<32x32xf32, #tpu.memory_space<vmem>>) attributes {dimension_semantics = [], scalar_prefetch = 0 : i64, scratch_operands = 0 : i64, tpu.core_type = #tpu.core_type<tc>} {
    %c0 = arith.constant 0 : index
    %c0_0 = arith.constant 0 : index
    %0 = vector.load %arg0[%c0, %c0_0] : memref<32x144xbf16, #tpu.memory_space<vmem>>, vector<32x144xbf16>
    %c0_1 = arith.constant 0 : index
    %c0_2 = arith.constant 0 : index
    %1 = vector.load %arg1[%c0_1, %c0_2] : memref<144x32xbf16, #tpu.memory_space<vmem>>, vector<144x32xbf16>
    %cst = arith.constant dense<0.000000e+00> : vector<32x32xf32>
    %2 = tpu.matmul %0, %1, %cst {dimension_numbers = #tpu.dot_dimension_numbers<[1], [0], [0], [1], [0, 0, 1, 1], [], []>} : vector<32x144xbf16>, vector<144x32xbf16>, vector<32x32xf32> -> vector<32x32xf32>
    %c0_3 = arith.constant 0 : index
    %c0_4 = arith.constant 0 : index
    %3 = vector.load %arg2[%c0_3, %c0_4] : memref<32x1xf32, #tpu.memory_space<vmem>>, vector<32x1xf32>
    %4 = vector.broadcast %3 : vector<32x1xf32> to vector<32x32xf32>
    %5 = arith.addf %2, %4 : vector<32x32xf32>
    %cst_5 = arith.constant 0.000000e+00 : f32
    %6 = vector.broadcast %cst_5 : f32 to vector<32x32xf32>
    %7 = arith.maximumf %5, %6 : vector<32x32xf32>
    %c0_6 = arith.constant 0 : index
    %c0_7 = arith.constant 0 : index
    %8 = vector.load %arg3[%c0_6, %c0_7] : memref<32x32xf32, #tpu.memory_space<vmem>>, vector<32x32xf32>
    tpu.vector_store %arg3[%c0_6, %c0_7], %7 {strides = array<i32>} : memref<32x32xf32, #tpu.memory_space<vmem>>, vector<32x32xf32>,
    return
  }
}

module attributes {stable_mosaic.version = 11 : i64} {
  func.func @_bilstm_embed_kernel(%arg0: memref<8x32xf32, #tpu.memory_space<vmem>>, %arg1: memref<32x256xf32, #tpu.memory_space<vmem>>, %arg2: memref<64x256xf32, #tpu.memory_space<vmem>>, %arg3: memref<1x256xf32, #tpu.memory_space<vmem>>, %arg4: memref<64x16xf32, #tpu.memory_space<vmem>>, %arg5: memref<1x16xf32, #tpu.memory_space<vmem>>, %arg6: memref<8x16xf32, #tpu.memory_space<vmem>>) attributes {dimension_semantics = [], scalar_prefetch = 0 : i64, scratch_operands = 0 : i64, tpu.core_type = #tpu.core_type<tc>} {
    %c0 = arith.constant 0 : index
    %c0_0 = arith.constant 0 : index
    %0 = vector.load %arg0[%c0, %c0_0] : memref<8x32xf32, #tpu.memory_space<vmem>>, vector<8x32xf32>
    %c0_1 = arith.constant 0 : index
    %c0_2 = arith.constant 0 : index
    %1 = vector.load %arg1[%c0_1, %c0_2] : memref<32x256xf32, #tpu.memory_space<vmem>>, vector<32x256xf32>
    %cst = arith.constant dense<0.000000e+00> : vector<8x256xf32>
    %2 = tpu.matmul %0, %1, %cst {dimension_numbers = #tpu.dot_dimension_numbers<[1], [0], [0], [1], [0, 0, 1, 1], [], []>} : vector<8x32xf32>, vector<32x256xf32>, vector<8x256xf32> -> vector<8x256xf32>
    %c0_3 = arith.constant 0 : index
    %c0_4 = arith.constant 0 : index
    %3 = vector.load %arg3[%c0_3, %c0_4] : memref<1x256xf32, #tpu.memory_space<vmem>>, vector<1x256xf32>
    %4 = vector.broadcast %3 : vector<1x256xf32> to vector<8x256xf32>
    %5 = arith.addf %2, %4 : vector<8x256xf32>
    %cst_5 = arith.constant 0.000000e+00 : f32
    %6 = vector.broadcast %cst_5 : f32 to vector<2x64xf32>
    %cst_6 = arith.constant 0.000000e+00 : f32
    %7 = vector.broadcast %cst_6 : f32 to vector<2x64xf32>
    %8 = vector.extract_strided_slice %5 {offsets = [0, 0], sizes = [2, 128], strides = [1, 1]} : vector<8x256xf32> to vector<2x128xf32>
    %9 = vector.extract_strided_slice %5 {offsets = [6, 128], sizes = [2, 128], strides = [1, 1]} : vector<8x256xf32> to vector<2x128xf32>
    %10 = tpu.concatenate %8, %9 in 1 : vector<2x128xf32>, vector<2x128xf32> -> vector<2x256xf32>
    %c0_7 = arith.constant 0 : index
    %c0_8 = arith.constant 0 : index
    %11 = vector.load %arg2[%c0_7, %c0_8] : memref<64x256xf32, #tpu.memory_space<vmem>>, vector<64x256xf32>
    %cst_9 = arith.constant dense<0.000000e+00> : vector<2x256xf32>
    %12 = tpu.matmul %6, %11, %cst_9 {dimension_numbers = #tpu.dot_dimension_numbers<[1], [0], [0], [1], [0, 0, 1, 1], [], []>} : vector<2x64xf32>, vector<64x256xf32>, vector<2x256xf32> -> vector<2x256xf32>
    %13 = arith.addf %10, %12 : vector<2x256xf32>
    %14 = arith.negf %13 : vector<2x256xf32>
    %15 = math.exp %14 : vector<2x256xf32>
    %cst_10 = arith.constant 1.000000e+00 : f32
    %16 = vector.broadcast %cst_10 : f32 to vector<2x256xf32>
    %17 = arith.addf %16, %15 : vector<2x256xf32>
    %18 = arith.divf %16, %17 : vector<2x256xf32>
    %19 = math.tanh %13 : vector<2x256xf32>
    %20 = vector.extract_strided_slice %18 {offsets = [0, 0], sizes = [2, 32], strides = [1, 1]} : vector<2x256xf32> to vector<2x32xf32>
    %21 = vector.extract_strided_slice %18 {offsets = [0, 128], sizes = [2, 32], strides = [1, 1]} : vector<2x256xf32> to vector<2x32xf32>
    %22 = tpu.concatenate %20, %21 in 1 : vector<2x32xf32>, vector<2x32xf32> -> vector<2x64xf32>
    %23 = vector.extract_strided_slice %18 {offsets = [0, 32], sizes = [2, 32], strides = [1, 1]} : vector<2x256xf32> to vector<2x32xf32>
    %24 = vector.extract_strided_slice %18 {offsets = [0, 160], sizes = [2, 32], strides = [1, 1]} : vector<2x256xf32> to vector<2x32xf32>
    %25 = tpu.concatenate %23, %24 in 1 : vector<2x32xf32>, vector<2x32xf32> -> vector<2x64xf32>
    %26 = vector.extract_strided_slice %19 {offsets = [0, 64], sizes = [2, 32], strides = [1, 1]} : vector<2x256xf32> to vector<2x32xf32>
    %27 = vector.extract_strided_slice %19 {offsets = [0, 192], sizes = [2, 32], strides = [1, 1]} : vector<2x256xf32> to vector<2x32xf32>
    %28 = tpu.concatenate %26, %27 in 1 : vector<2x32xf32>, vector<2x32xf32> -> vector<2x64xf32>
    %29 = vector.extract_strided_slice %18 {offsets = [0, 96], sizes = [2, 32], strides = [1, 1]} : vector<2x256xf32> to vector<2x32xf32>
    %30 = vector.extract_strided_slice %18 {offsets = [0, 224], sizes = [2, 32], strides = [1, 1]} : vector<2x256xf32> to vector<2x32xf32>
    %31 = tpu.concatenate %29, %30 in 1 : vector<2x32xf32>, vector<2x32xf32> -> vector<2x64xf32>
    %32 = arith.mulf %25, %7 : vector<2x64xf32>
    %33 = arith.mulf %22, %28 : vector<2x64xf32>
    %34 = arith.addf %32, %33 : vector<2x64xf32>
    %35 = math.tanh %34 : vector<2x64xf32>
    %36 = arith.mulf %31, %35 : vector<2x64xf32>
    %37 = vector.extract_strided_slice %5 {offsets = [2, 0], sizes = [2, 128], strides = [1, 1]} : vector<8x256xf32> to vector<2x128xf32>
    %38 = vector.extract_strided_slice %5 {offsets = [4, 128], sizes = [2, 128], strides = [1, 1]} : vector<8x256xf32> to vector<2x128xf32>
    %39 = tpu.concatenate %37, %38 in 1 : vector<2x128xf32>, vector<2x128xf32> -> vector<2x256xf32>
    %c0_11 = arith.constant 0 : index
    %c0_12 = arith.constant 0 : index
    %40 = vector.load %arg2[%c0_11, %c0_12] : memref<64x256xf32, #tpu.memory_space<vmem>>, vector<64x256xf32>
    %cst_13 = arith.constant dense<0.000000e+00> : vector<2x256xf32>
    %41 = tpu.matmul %36, %40, %cst_13 {dimension_numbers = #tpu.dot_dimension_numbers<[1], [0], [0], [1], [0, 0, 1, 1], [], []>} : vector<2x64xf32>, vector<64x256xf32>, vector<2x256xf32> -> vector<2x256xf32>
    %42 = arith.addf %39, %41 : vector<2x256xf32>
    %43 = arith.negf %42 : vector<2x256xf32>
    %44 = math.exp %43 : vector<2x256xf32>
    %cst_14 = arith.constant 1.000000e+00 : f32
    %45 = vector.broadcast %cst_14 : f32 to vector<2x256xf32>
    %46 = arith.addf %45, %44 : vector<2x256xf32>
    %47 = arith.divf %45, %46 : vector<2x256xf32>
    %48 = math.tanh %42 : vector<2x256xf32>
    %49 = vector.extract_strided_slice %47 {offsets = [0, 0], sizes = [2, 32], strides = [1, 1]} : vector<2x256xf32> to vector<2x32xf32>
    %50 = vector.extract_strided_slice %47 {offsets = [0, 128], sizes = [2, 32], strides = [1, 1]} : vector<2x256xf32> to vector<2x32xf32>
    %51 = tpu.concatenate %49, %50 in 1 : vector<2x32xf32>, vector<2x32xf32> -> vector<2x64xf32>
    %52 = vector.extract_strided_slice %47 {offsets = [0, 32], sizes = [2, 32], strides = [1, 1]} : vector<2x256xf32> to vector<2x32xf32>
    %53 = vector.extract_strided_slice %47 {offsets = [0, 160], sizes = [2, 32], strides = [1, 1]} : vector<2x256xf32> to vector<2x32xf32>
    %54 = tpu.concatenate %52, %53 in 1 : vector<2x32xf32>, vector<2x32xf32> -> vector<2x64xf32>
    %55 = vector.extract_strided_slice %48 {offsets = [0, 64], sizes = [2, 32], strides = [1, 1]} : vector<2x256xf32> to vector<2x32xf32>
    %56 = vector.extract_strided_slice %48 {offsets = [0, 192], sizes = [2, 32], strides = [1, 1]} : vector<2x256xf32> to vector<2x32xf32>
    %57 = tpu.concatenate %55, %56 in 1 : vector<2x32xf32>, vector<2x32xf32> -> vector<2x64xf32>
    %58 = vector.extract_strided_slice %47 {offsets = [0, 96], sizes = [2, 32], strides = [1, 1]} : vector<2x256xf32> to vector<2x32xf32>
    %59 = vector.extract_strided_slice %47 {offsets = [0, 224], sizes = [2, 32], strides = [1, 1]} : vector<2x256xf32> to vector<2x32xf32>
    %60 = tpu.concatenate %58, %59 in 1 : vector<2x32xf32>, vector<2x32xf32> -> vector<2x64xf32>
    %61 = arith.mulf %54, %34 : vector<2x64xf32>
    %62 = arith.mulf %51, %57 : vector<2x64xf32>
    %63 = arith.addf %61, %62 : vector<2x64xf32>
    %64 = math.tanh %63 : vector<2x64xf32>
    %65 = arith.mulf %60, %64 : vector<2x64xf32>
    %66 = vector.extract_strided_slice %5 {offsets = [4, 0], sizes = [2, 128], strides = [1, 1]} : vector<8x256xf32> to vector<2x128xf32>
    %67 = vector.extract_strided_slice %5 {offsets = [2, 128], sizes = [2, 128], strides = [1, 1]} : vector<8x256xf32> to vector<2x128xf32>
    %68 = tpu.concatenate %66, %67 in 1 : vector<2x128xf32>, vector<2x128xf32> -> vector<2x256xf32>
    %c0_15 = arith.constant 0 : index
    %c0_16 = arith.constant 0 : index
    %69 = vector.load %arg2[%c0_15, %c0_16] : memref<64x256xf32, #tpu.memory_space<vmem>>, vector<64x256xf32>
    %cst_17 = arith.constant dense<0.000000e+00> : vector<2x256xf32>
    %70 = tpu.matmul %65, %69, %cst_17 {dimension_numbers = #tpu.dot_dimension_numbers<[1], [0], [0], [1], [0, 0, 1, 1], [], []>} : vector<2x64xf32>, vector<64x256xf32>, vector<2x256xf32> -> vector<2x256xf32>
    %71 = arith.addf %68, %70 : vector<2x256xf32>
    %72 = arith.negf %71 : vector<2x256xf32>
    %73 = math.exp %72 : vector<2x256xf32>
    %cst_18 = arith.constant 1.000000e+00 : f32
    %74 = vector.broadcast %cst_18 : f32 to vector<2x256xf32>
    %75 = arith.addf %74, %73 : vector<2x256xf32>
    %76 = arith.divf %74, %75 : vector<2x256xf32>
    %77 = math.tanh %71 : vector<2x256xf32>
    %78 = vector.extract_strided_slice %76 {offsets = [0, 0], sizes = [2, 32], strides = [1, 1]} : vector<2x256xf32> to vector<2x32xf32>
    %79 = vector.extract_strided_slice %76 {offsets = [0, 128], sizes = [2, 32], strides = [1, 1]} : vector<2x256xf32> to vector<2x32xf32>
    %80 = tpu.concatenate %78, %79 in 1 : vector<2x32xf32>, vector<2x32xf32> -> vector<2x64xf32>
    %81 = vector.extract_strided_slice %76 {offsets = [0, 32], sizes = [2, 32], strides = [1, 1]} : vector<2x256xf32> to vector<2x32xf32>
    %82 = vector.extract_strided_slice %76 {offsets = [0, 160], sizes = [2, 32], strides = [1, 1]} : vector<2x256xf32> to vector<2x32xf32>
    %83 = tpu.concatenate %81, %82 in 1 : vector<2x32xf32>, vector<2x32xf32> -> vector<2x64xf32>
    %84 = vector.extract_strided_slice %77 {offsets = [0, 64], sizes = [2, 32], strides = [1, 1]} : vector<2x256xf32> to vector<2x32xf32>
    %85 = vector.extract_strided_slice %77 {offsets = [0, 192], sizes = [2, 32], strides = [1, 1]} : vector<2x256xf32> to vector<2x32xf32>
    %86 = tpu.concatenate %84, %85 in 1 : vector<2x32xf32>, vector<2x32xf32> -> vector<2x64xf32>
    %87 = vector.extract_strided_slice %76 {offsets = [0, 96], sizes = [2, 32], strides = [1, 1]} : vector<2x256xf32> to vector<2x32xf32>
    %88 = vector.extract_strided_slice %76 {offsets = [0, 224], sizes = [2, 32], strides = [1, 1]} : vector<2x256xf32> to vector<2x32xf32>
    %89 = tpu.concatenate %87, %88 in 1 : vector<2x32xf32>, vector<2x32xf32> -> vector<2x64xf32>
    %90 = arith.mulf %83, %63 : vector<2x64xf32>
    %91 = arith.mulf %80, %86 : vector<2x64xf32>
    %92 = arith.addf %90, %91 : vector<2x64xf32>
    %93 = math.tanh %92 : vector<2x64xf32>
    %94 = arith.mulf %89, %93 : vector<2x64xf32>
    %95 = vector.extract_strided_slice %5 {offsets = [6, 0], sizes = [2, 128], strides = [1, 1]} : vector<8x256xf32> to vector<2x128xf32>
    %96 = vector.extract_strided_slice %5 {offsets = [0, 128], sizes = [2, 128], strides = [1, 1]} : vector<8x256xf32> to vector<2x128xf32>
    %97 = tpu.concatenate %95, %96 in 1 : vector<2x128xf32>, vector<2x128xf32> -> vector<2x256xf32>
    %c0_19 = arith.constant 0 : index
    %c0_20 = arith.constant 0 : index
    %98 = vector.load %arg2[%c0_19, %c0_20] : memref<64x256xf32, #tpu.memory_space<vmem>>, vector<64x256xf32>
    %cst_21 = arith.constant dense<0.000000e+00> : vector<2x256xf32>
    %99 = tpu.matmul %94, %98, %cst_21 {dimension_numbers = #tpu.dot_dimension_numbers<[1], [0], [0], [1], [0, 0, 1, 1], [], []>} : vector<2x64xf32>, vector<64x256xf32>, vector<2x256xf32> -> vector<2x256xf32>
    %100 = arith.addf %97, %99 : vector<2x256xf32>
    %101 = arith.negf %100 : vector<2x256xf32>
    %102 = math.exp %101 : vector<2x256xf32>
    %cst_22 = arith.constant 1.000000e+00 : f32
    %103 = vector.broadcast %cst_22 : f32 to vector<2x256xf32>
    %104 = arith.addf %103, %102 : vector<2x256xf32>
    %105 = arith.divf %103, %104 : vector<2x256xf32>
    %106 = math.tanh %100 : vector<2x256xf32>
    %107 = vector.extract_strided_slice %105 {offsets = [0, 0], sizes = [2, 32], strides = [1, 1]} : vector<2x256xf32> to vector<2x32xf32>
    %108 = vector.extract_strided_slice %105 {offsets = [0, 128], sizes = [2, 32], strides = [1, 1]} : vector<2x256xf32> to vector<2x32xf32>
    %109 = tpu.concatenate %107, %108 in 1 : vector<2x32xf32>, vector<2x32xf32> -> vector<2x64xf32>
    %110 = vector.extract_strided_slice %105 {offsets = [0, 32], sizes = [2, 32], strides = [1, 1]} : vector<2x256xf32> to vector<2x32xf32>
    %111 = vector.extract_strided_slice %105 {offsets = [0, 160], sizes = [2, 32], strides = [1, 1]} : vector<2x256xf32> to vector<2x32xf32>
    %112 = tpu.concatenate %110, %111 in 1 : vector<2x32xf32>, vector<2x32xf32> -> vector<2x64xf32>
    %113 = vector.extract_strided_slice %106 {offsets = [0, 64], sizes = [2, 32], strides = [1, 1]} : vector<2x256xf32> to vector<2x32xf32>
    %114 = vector.extract_strided_slice %106 {offsets = [0, 192], sizes = [2, 32], strides = [1, 1]} : vector<2x256xf32> to vector<2x32xf32>
    %115 = tpu.concatenate %113, %114 in 1 : vector<2x32xf32>, vector<2x32xf32> -> vector<2x64xf32>
    %116 = vector.extract_strided_slice %105 {offsets = [0, 96], sizes = [2, 32], strides = [1, 1]} : vector<2x256xf32> to vector<2x32xf32>
    %117 = vector.extract_strided_slice %105 {offsets = [0, 224], sizes = [2, 32], strides = [1, 1]} : vector<2x256xf32> to vector<2x32xf32>
    %118 = tpu.concatenate %116, %117 in 1 : vector<2x32xf32>, vector<2x32xf32> -> vector<2x64xf32>
    %119 = arith.mulf %112, %92 : vector<2x64xf32>
    %120 = arith.mulf %109, %115 : vector<2x64xf32>
    %121 = arith.addf %119, %120 : vector<2x64xf32>
    %122 = math.tanh %121 : vector<2x64xf32>
    %123 = arith.mulf %118, %122 : vector<2x64xf32>
    %124 = vector.extract_strided_slice %36 {offsets = [0, 0], sizes = [2, 32], strides = [1, 1]} : vector<2x64xf32> to vector<2x32xf32>
    %125 = vector.extract_strided_slice %123 {offsets = [0, 32], sizes = [2, 32], strides = [1, 1]} : vector<2x64xf32> to vector<2x32xf32>
    %126 = tpu.concatenate %124, %125 in 1 : vector<2x32xf32>, vector<2x32xf32> -> vector<2x64xf32>
    %127 = vector.extract_strided_slice %65 {offsets = [0, 0], sizes = [2, 32], strides = [1, 1]} : vector<2x64xf32> to vector<2x32xf32>
    %128 = vector.extract_strided_slice %94 {offsets = [0, 32], sizes = [2, 32], strides = [1, 1]} : vector<2x64xf32> to vector<2x32xf32>
    %129 = tpu.concatenate %127, %128 in 1 : vector<2x32xf32>, vector<2x32xf32> -> vector<2x64xf32>
    %130 = vector.extract_strided_slice %94 {offsets = [0, 0], sizes = [2, 32], strides = [1, 1]} : vector<2x64xf32> to vector<2x32xf32>
    %131 = vector.extract_strided_slice %65 {offsets = [0, 32], sizes = [2, 32], strides = [1, 1]} : vector<2x64xf32> to vector<2x32xf32>
    %132 = tpu.concatenate %130, %131 in 1 : vector<2x32xf32>, vector<2x32xf32> -> vector<2x64xf32>
    %133 = vector.extract_strided_slice %123 {offsets = [0, 0], sizes = [2, 32], strides = [1, 1]} : vector<2x64xf32> to vector<2x32xf32>
    %134 = vector.extract_strided_slice %36 {offsets = [0, 32], sizes = [2, 32], strides = [1, 1]} : vector<2x64xf32> to vector<2x32xf32>
    %135 = tpu.concatenate %133, %134 in 1 : vector<2x32xf32>, vector<2x32xf32> -> vector<2x64xf32>
    %136 = tpu.concatenate %126, %129, %132, %135 in 0 : vector<2x64xf32>, vector<2x64xf32>, vector<2x64xf32>, vector<2x64xf32> -> vector<8x64xf32>
    %c0_23 = arith.constant 0 : index
    %c0_24 = arith.constant 0 : index
    %137 = vector.load %arg4[%c0_23, %c0_24] : memref<64x16xf32, #tpu.memory_space<vmem>>, vector<64x16xf32>
    %cst_25 = arith.constant dense<0.000000e+00> : vector<8x16xf32>
    %138 = tpu.matmul %136, %137, %cst_25 {dimension_numbers = #tpu.dot_dimension_numbers<[1], [0], [0], [1], [0, 0, 1, 1], [], []>} : vector<8x64xf32>, vector<64x16xf32>, vector<8x16xf32> -> vector<8x16xf32>
    %c0_26 = arith.constant 0 : index
    %c0_27 = arith.constant 0 : index
    %139 = vector.load %arg5[%c0_26, %c0_27] : memref<1x16xf32, #tpu.memory_space<vmem>>, vector<1x16xf32>
    %140 = vector.broadcast %139 : vector<1x16xf32> to vector<8x16xf32>
    %141 = arith.addf %138, %140 : vector<8x16xf32>
    %cst_28 = arith.constant dense<0xFF800000> : vector<8xf32>
    %142 = vector.multi_reduction <maximumf>, %141, %cst_28 [1] : vector<8x16xf32> to vector<8xf32>
    %143 = vector.shape_cast %142 : vector<8xf32> to vector<8x1xf32>
    %144 = vector.broadcast %143 : vector<8x1xf32> to vector<8x16xf32>
    %145 = arith.subf %141, %144 : vector<8x16xf32>
    %146 = math.exp %145 : vector<8x16xf32>
    %cst_29 = arith.constant dense<0.000000e+00> : vector<8xf32>
    %147 = vector.multi_reduction <add>, %146, %cst_29 [1] : vector<8x16xf32> to vector<8xf32>
    %148 = vector.shape_cast %147 : vector<8xf32> to vector<8x1xf32>
    %149 = math.log %148 : vector<8x1xf32>
    %150 = arith.addf %143, %149 : vector<8x1xf32>
    %151 = vector.broadcast %150 : vector<8x1xf32> to vector<8x16xf32>
    %152 = arith.subf %141, %151 : vector<8x16xf32>
    %c0_30 = arith.constant 0 : index
    %c0_31 = arith.constant 0 : index
    %153 = vector.load %arg6[%c0_30, %c0_31] : memref<8x16xf32, #tpu.memory_space<vmem>>, vector<8x16xf32>
    tpu.vector_store %arg6[%c0_30, %c0_31], %152 {strides = array<i32>} : memref<8x16xf32, #tpu.memory_space<vmem>>, vector<8x16xf32>,
    return
  }
}

</mosaic_0001>

<bundles_post_ra>
// kernel: rcnn_forward.4
= control target key start
LH: loop header
LB: loop body
LE: loop exit
PB: predicated region body
PF: predicated region fallthrough
CT: control target
= control target key end

     0   :  { %vm46_vm0 = vcmask 1043456   ;;  %vm47_vm1 = vcmask 1044480   ;;  %v171_v1 = vmov 0   ;;  %v172_v2 = vmov 65535   ;;  %s223_s1 = inlined_call_operand.vmem [shape: bf16[9,512], index: 1, kind: input, shape index: {}]   ;;  %s224_s2 = inlined_call_operand.vmem [shape: f32[8,1], index: 2, kind: input, shape index: {}]   ;;  %s225_s0 = inlined_call_operand.vmem [shape: bf16[8,9], index: 0, kind: input, shape index: {}]   ;;  %s226_s3 = inlined_call_operand.vmem [shape: f32[8,512], index: 3, kind: output, shape index: {}]  }
   0x1   :  { %v165_v0 = vld [vmem:[%s223_s1 + $0x4] ss:$16 sps:$4 sm:$0x1f]   ;;  %94 = vmatprep.mubr.bf16.mxu0 %v171_v1  ;;  %135 = vmatprep.mubr.bf16.mxu1 %v171_v1  ;;  %v48_v3 = vsel %vm46_vm0, 4294967295, %v172_v2  ;;  %v15_v13 = vld [vmem:[%s225_s0] sm:$0xf] }
   0x2   :  { %164 = vset.pattern.permute.xlu0 %v171_v1  ;;  %v49_v4 = vsel %vm47_vm1, %v48_v3, 0  ;;  %v167_v5 = vld [vmem:[%s223_s1 + $0xc] ss:$16 sps:$4 sm:$0x1f]   ;;  %v20_v6 = vld [vmem:[%s224_s2] sm:$0xff]  ;;  %vm42_vm2 = vcmask 72704  }
   0x3   :  { %v54_v7 = vand.u32 %v165_v0, %v49_v4  ;;  %v169_v8 = vld [vmem:[%s223_s1] ss:$16 sps:$4 sm:$0x1f]   ;;  %v170_v9 = vld [vmem:[%s223_s1 + $0x8] ss:$16 sps:$4 sm:$0x1f]   ;;  %23 = vperm.xlu0 %164, %v20_v6   ;;  %v60_v10 = vand.u32 %v167_v5, %v49_v4 }
   0x4   :  { %v51_v11 = vand.u32 %v169_v8, %v49_v4  ;;  %v57_v12 = vand.u32 %v170_v9, %v49_v4 }
   0x5   :  { %62 = vmatprep.subr.bf16.mxu0 %v54_v7  ;;  %103 = vmatprep.subr.bf16.mxu1 %v60_v10 }
   0x6   :  { %63 = vmatpush1.bf16.msra.mxu0 %v51_v11  ;;  %104 = vmatpush1.bf16.msra.mxu1 %v57_v12 }
   0x9   :  { %160 = vmatmul.mubr.msk.bf16.vlgmr.msra.gmra.mrb[0].mxu0 %vm42_vm2, %v15_v13  ;;  %161 = vmatmul.mubr.msk.bf16.vlgmr.msra.gmra.mrb[0].mxu1 %vm42_vm2, %v15_v13 }
  0x82   :  { %v24_v14 = vpop.permute.xlu0 %23 }
  0xdc   :  { %v96_v15 = vpop.f32.mrb[0].mxu0  ;;  %v137_v16 = vpop.f32.mrb[0].mxu1 }
  0xdd   :  { %v97_v17 = vadd.f32 %v96_v15, %v24_v14  ;;  %v138_v18 = vadd.f32 %v137_v16, %v24_v14  ;;  %v98_v19 = vpop.f32.mrb[1].mxu0  ;;  %v139_v20 = vpop.f32.mrb[1].mxu1 }
  0xde   :  { %v99_v21 = vadd.f32 %v98_v19, %v24_v14  ;;  %v140_v22 = vadd.f32 %v139_v20, %v24_v14  ;;  %v100_v23 = vpop.f32.mrb[2].mxu0  ;;  %v141_v24 = vpop.f32.mrb[2].mxu1 }
  0xdf   :  { %v144_v25 = vmax.f32 %v97_v17, 0.0  ;;  %v146_v26 = vmax.f32 %v138_v18, 0.0  ;;  %v101_v27 = vpop.f32.mrb[3].mxu0  ;;  %v142_v28 = vpop.f32.mrb[3].mxu1 }
  0xe0   :  { %v145_v29 = vmax.f32 %v99_v21, 0.0  ;;  %v147_v30 = vmax.f32 %v140_v22, 0.0 }
  0xe1   :  { %148 = vst [vmem:[%s226_s3] sm:$0xff] %v144_v25  ;;  %150 = vst [vmem:[%s226_s3 + $0x10] sm:$0xff] %v146_v26 }
  0xe2   :  { %149 = vst [vmem:[%s226_s3 + $0x8] sm:$0xff] %v145_v29  ;;  %151 = vst [vmem:[%s226_s3 + $0x18] sm:$0xff] %v147_v30 }

// kernel: rcnn_forward.5
= control target key start
LH: loop header
LB: loop body
LE: loop exit
PB: predicated region body
PF: predicated region fallthrough
CT: control target
= control target key end

     0   :  { %v164_v0 = vmov 0.0   ;;  %vm165_vm0 = vmmov 0   ;;  %v166_v2 = vmov 0   ;;  %vm74_vm1 = vcmask 1043456   ;;  %s217_s1 = inlined_call_operand.vmem [shape: bf16[72,128], index: 1, kind: input, shape index: {}]   ;;  %s218_s2 = inlined_call_operand.vmem [shape: f32[16,1], index: 2, kind: input, shape index: {}]   ;;  %s219_s0 = inlined_call_operand.vmem [shape: bf16[16,72], index: 0, kind: input, shape index: {}]   ;;  %s220_s3 = inlined_call_operand.vmem [shape: f32[16,128], index: 3, kind: output, shape index: {}]  }
   0x1   :  { %140 = vmatprep.subr.bf16.mxu0 %v164_v0  ;;  %v158_v1 = vld [vmem:[%s217_s1] sm:$0xff]   ;;  %150 = vmatprep.mubr.msk.bf16.mxu0 %vm165_vm0, %v164_v0  ;;  %v159_v3 = vld [vmem:[%s217_s1 + $0x8] sm:$0xff]   ;;  %v160_v5 = vld [vmem:[%s217_s1 + $0x10] sm:$0xff]   ;;  %vm70_vm2 = vcmask 588800  }
   0x2   :  { %157 = vset.pattern.permute.xlu0 %v166_v2  ;;  %141 = vmatpush3.bf16.msra.mxu0 %v158_v1  ;;  %v26_v4 = vld [vmem:[%s218_s2] sm:$0xff]  ;;  %v27_v6 = vld [vmem:[%s218_s2 + $0x8] sm:$0xff]  ;;  %v161_v7 = vld [vmem:[%s217_s1 + $0x18] sm:$0xff]  }
   0x3   :  { %142 = vmatprep.subr.bf16.mxu0 %v164_v0  ;;  %30 = vperm.xlu0 %157, %v26_v4   ;;  %v162_v8 = vld [vmem:[%s217_s1 + $0x20] ss:$0 sps:$4 sm:$0xff]  }
   0x4   :  { %v76_v9 = vsel %vm74_vm1, %v162_v8, 0  ;;  %v163_v10 = vld [vmem:[%s219_s0] sm:$0xff]  }
   0x6   :  { %143 = vmatpush3.bf16.msra.mxu0 %v159_v3 }
   0x7   :  { %144 = vmatprep.subr.bf16.mxu0 %v164_v0  ;;  %35 = vperm.xlu0 %157, %v27_v6  }
   0xa   :  { %145 = vmatpush3.bf16.msra.mxu0 %v160_v5 }
   0xb   :  { %146 = vmatprep.subr.bf16.mxu0 %v164_v0 }
   0xe   :  { %147 = vmatpush3.bf16.msra.mxu0 %v161_v7 }
   0xf   :  { %148 = vmatprep.subr.bf16.mxu0 %v164_v0 }
  0x12   :  { %149 = vmatpush3.bf16.msra.mxu0 %v76_v9 }
  0x15   :  { %151 = vmatmul.mubr.msk.bf16.vlgmr.msra.gmra.mrb[0].mxu0 %vm70_vm2, %v163_v10 }
  0x82   :  { %v31_v11 = vpop.permute.xlu0 %30 }
  0x86   :  { %v36_v15 = vpop.permute.xlu0 %35 }
  0xe8   :  { %v112_v12 = vpop.f32.mrb[0].mxu0 }
  0xe9   :  { %v113_v13 = vadd.f32 %v112_v12, %v31_v11  ;;  %v152_v14 = vpop.f32.mrb[1].mxu0 }
  0xea   :  { %v115_v16 = vpop.f32.mrb[2].mxu0 }
  0xeb   :  { %v119_v17 = vmax.f32 %v113_v13, 0.0  ;;  %v116_v18 = vadd.f32 %v115_v16, %v36_v15  ;;  %v153_v19 = vpop.f32.mrb[3].mxu0 }
  0xed   :  { %121 = vst [vmem:[%s220_s3] sm:$0xff] %v119_v17  ;;  %v120_v20 = vmax.f32 %v116_v18, 0.0 }
  0xef   :  { %122 = vst [vmem:[%s220_s3 + $0x8] sm:$0xff] %v120_v20 }

// kernel: rcnn_forward.6
= control target key start
LH: loop header
LB: loop body
LE: loop exit
PB: predicated region body
PF: predicated region fallthrough
CT: control target
= control target key end

     0   :  { %v253_v0 = vmov 0   ;;  %vm133_vm0 = vcmask 130048   ;;  %vm193_vm1 = vcmask 261120   ;;  %s337_s1 = inlined_call_operand.vmem [shape: bf16[144,32], index: 1, kind: input, shape index: {}]   ;;  %s338_s0 = inlined_call_operand.vmem [shape: bf16[32,144], index: 0, kind: input, shape index: {}]   ;;  %s339_s2 = inlined_call_operand.vmem [shape: f32[32,1], index: 2, kind: input, shape index: {}]   ;;  %s340_s3 = inlined_call_operand.vmem [shape: f32[32,32], index: 3, kind: output, shape index: {}]  }
   0x1   :  { %140 = vmatprep.subr.bf16.mxu0 %v253_v0  ;;  %217 = vmatprep.subr.bf16.mxu1 %v253_v0  ;;  %v238_v1 = vld [vmem:[%s337_s1] sm:$0xff]   ;;  %v239_v2 = vld [vmem:[%s337_s1 + $0x8] sm:$0xff]   ;;  %v240_v3 = vld [vmem:[%s337_s1 + $0x10] sm:$0xff]  }
   0x2   :  { %237 = vset.pattern.permute.xlu1 %v253_v0  ;;  %236 = vset.pattern.permute.xlu0 %v253_v0  ;;  %v241_v4 = vld [vmem:[%s337_s1 + $0x18] sm:$0xff]   ;;  %v249_v5 = vld [vmem:[%s338_s0 + $0x4] ss:$8 sps:$4 sm:$0xff]   ;;  %v39_v7 = vld [vmem:[%s339_s2 + $0x10] sm:$0xff] }
   0x3   :  { %141 = vmatpush1.bf16.msra.mxu0 %v238_v1  ;;  %226 = vmatpush1.bf16.msra.mxu1 %v238_v1  ;;  %v252_v6 = vld [vmem:[%s338_s0 + $0x14] ss:$8 sps:$4 sm:$0xff]   ;;  %v37_v8 = vld [vmem:[%s339_s2] sm:$0xff]  ;;  %v38_v11 = vld [vmem:[%s339_s2 + $0x8] sm:$0xff] }
   0x4   :  { %142 = vmatprep.subr.bf16.mxu0 %v253_v0  ;;  %218 = vmatprep.subr.bf16.mxu1 %v253_v0  ;;  %v40_v9 = vld [vmem:[%s339_s2 + $0x18] sm:$0xff]  ;;  %v242_v10 = vld [vmem:[%s337_s1 + $0x20] sm:$0xff]   ;;  %v243_v12 = vld [vmem:[%s337_s1 + $0x28] sm:$0xff]  }
   0x5   :  { %215 = vmatprep.mubr.msk.bf16.mxu0 %vm133_vm0, %v249_v5  ;;  %53 = vperm.xlu1 %237, %v39_v7   ;;  %v244_v13 = vld [vmem:[%s337_s1 + $0x30] sm:$0xff]   ;;  %v245_v14 = vld [vmem:[%s337_s1 + $0x38] sm:$0xff]   ;;  %v246_v15 = vld [vmem:[%s337_s1 + $0x40] sm:$0xff]  }
   0x6   :  { %216 = vmatprep.mubr.msk.bf16.mxu1 %vm133_vm0, %v252_v6  ;;  %43 = vperm.xlu0 %236, %v37_v8   ;;  %v247_v16 = vld [vmem:[%s338_s0] ss:$8 sps:$4 sm:$0xff]   ;;  %v250_v17 = vld [vmem:[%s338_s0 + $0x10] ss:$8 sps:$4 sm:$0xff]  }
   0x7   :  { %143 = vmatpush1.bf16.msra.mxu0 %v239_v2  ;;  %227 = vmatpush1.bf16.msra.mxu1 %v239_v2 }
   0x8   :  { %144 = vmatprep.subr.bf16.mxu0 %v253_v0  ;;  %219 = vmatprep.subr.bf16.mxu1 %v253_v0 }
   0x9   :  { %58 = vperm.xlu1 %237, %v40_v9  }
   0xa   :  { %48 = vperm.xlu0 %236, %v38_v11  }
   0xb   :  { %145 = vmatpush1.bf16.msra.mxu0 %v240_v3  ;;  %228 = vmatpush1.bf16.msra.mxu1 %v240_v3 }
   0xc   :  { %146 = vmatprep.subr.bf16.mxu0 %v253_v0  ;;  %220 = vmatprep.subr.bf16.mxu1 %v253_v0 }
   0xf   :  { %147 = vmatpush1.bf16.msra.mxu0 %v241_v4  ;;  %229 = vmatpush1.bf16.msra.mxu1 %v241_v4 }
  0x10   :  { %148 = vmatprep.subr.bf16.mxu0 %v253_v0  ;;  %221 = vmatprep.subr.bf16.mxu1 %v253_v0 }
  0x13   :  { %149 = vmatpush1.bf16.msra.mxu0 %v242_v10  ;;  %230 = vmatpush1.bf16.msra.mxu1 %v242_v10 }
  0x14   :  { %150 = vmatprep.subr.bf16.mxu0 %v253_v0  ;;  %222 = vmatprep.subr.bf16.mxu1 %v253_v0 }
  0x17   :  { %151 = vmatpush1.bf16.msra.mxu0 %v243_v12  ;;  %231 = vmatpush1.bf16.msra.mxu1 %v243_v12 }
  0x18   :  { %152 = vmatprep.subr.bf16.mxu0 %v253_v0  ;;  %223 = vmatprep.subr.bf16.mxu1 %v253_v0 }
  0x1b   :  { %153 = vmatpush1.bf16.msra.mxu0 %v244_v13  ;;  %232 = vmatpush1.bf16.msra.mxu1 %v244_v13 }
  0x1c   :  { %154 = vmatprep.subr.bf16.mxu0 %v253_v0  ;;  %224 = vmatprep.subr.bf16.mxu1 %v253_v0 }
  0x1f   :  { %155 = vmatpush1.bf16.msra.mxu0 %v245_v14  ;;  %233 = vmatpush1.bf16.msra.mxu1 %v245_v14 }
  0x20   :  { %156 = vmatprep.subr.bf16.mxu0 %v253_v0  ;;  %225 = vmatprep.subr.bf16.mxu1 %v253_v0 }
  0x23   :  { %157 = vmatpush1.bf16.msra.mxu0 %v246_v15  ;;  %234 = vmatpush1.bf16.msra.mxu1 %v246_v15 }
  0x26   :  { %173 = vmatmul.mubr.bf16.vlgmr.msra.gmra.mrb[0].mxu0 %v247_v16  ;;  %181 = vmatmul.mubr.bf16.vlgmr.msra.gmra.mrb[0].mxu1 %v250_v17 }
  0x84   :  { %v54_v18 = vpop.permute.xlu1 %53 }
  0x85   :  { %v44_v19 = vpop.permute.xlu0 %43 }
  0x88   :  { %v59_v20 = vpop.permute.xlu1 %58 }
  0x89   :  { %v49_v21 = vpop.permute.xlu0 %48 }
  0xf9   :  { %v174_v22 = vpop.f32.mrb[0].mxu0  ;;  %v182_v23 = vpop.f32.mrb[0].mxu1 }
  0xfa   :  { %v175_v24 = vadd.f32 %v174_v22, %v44_v19  ;;  %v183_v25 = vadd.f32 %v182_v23, %v54_v18  ;;  %v176_v26 = vpop.f32.mrb[1].mxu0  ;;  %v184_v27 = vpop.f32.mrb[1].mxu1 }
  0xfb   :  { %v177_v28 = vpop.f32.mrb[2].mxu0  ;;  %v185_v29 = vpop.f32.mrb[2].mxu1 }
  0xfc   :  { %v189_v30 = vmax.f32 %v175_v24, 0.0  ;;  %v191_v31 = vmax.f32 %v183_v25, 0.0  ;;  %v178_v32 = vadd.f32 %v177_v28, %v49_v21  ;;  %v186_v33 = vadd.f32 %v185_v29, %v59_v20  ;;  %v179_v34 = vpop.f32.mrb[3].mxu0  ;;  %v187_v35 = vpop.f32.mrb[3].mxu1 }
  0xfe   :  { %194 = vst.msk [vmem:[%s340_s3] sm:$0xff] %vm193_vm1, %v189_v30  ;;  %196 = vst.msk [vmem:[%s340_s3 + $0x10] sm:$0xff] %vm193_vm1, %v191_v31  ;;  %v190_v36 = vmax.f32 %v178_v32, 0.0  ;;  %v192_v37 = vmax.f32 %v186_v33, 0.0 }
 0x100   :  { %195 = vst.msk [vmem:[%s340_s3 + $0x8] sm:$0xff] %vm193_vm1, %v190_v36  ;;  %197 = vst.msk [vmem:[%s340_s3 + $0x18] sm:$0xff] %vm193_vm1, %v192_v37 }

// kernel: rcnn_forward.7
= control target key start
LH: loop header
LB: loop body
LE: loop exit
PB: predicated region body
PF: predicated region fallthrough
CT: control target
= control target key end

     0   :  { %v1008_v7 = vmov 0.0   ;;  %s1311_s0 = inlined_call_operand.vmem [shape: f32[8,32], index: 0, kind: input, shape index: {}]   ;;  %s1312_s1 = inlined_call_operand.vmem [shape: f32[32,256], index: 1, kind: input, shape index: {}]   ;;  %s1313_s2 = inlined_call_operand.vmem [shape: f32[64,256], index: 2, kind: input, shape index: {}]   ;;  %s1314_s3 = inlined_call_operand.vmem [shape: f32[1,256], index: 3, kind: input, shape index: {}]   ;;  %s1315_s4 = inlined_call_operand.vmem [shape: f32[64,16], index: 4, kind: input, shape index: {}]   ;;  %s1316_s5 = inlined_call_operand.vmem [shape: f32[1,16], index: 5, kind: input, shape index: {}]   ;;  %s1317_s6 = inlined_call_operand.hbm [shape: f32[8,16], index: 6, kind: output, shape index: {}]  }
   0x1   :  { %v124_v0 = vld [vmem:[%s1313_s2 + $0x8] sm:$0xff]  ;;  %v126_v1 = vld [vmem:[%s1313_s2 + $0x18] sm:$0xff]  ;;  %v123_v2 = vld [vmem:[%s1313_s2] sm:$0xff]  ;;  %113 = vmatprep.mubr.f32.mxu0 %v1008_v7  ;;  %207 = vmatprep.mubr.f32.mxu1 %v1008_v7 }
   0x2   :  { %v1059_v3 = vpack.c.bf16 %v126_v1, %v124_v0  ;;  %v125_v4 = vld [vmem:[%s1313_s2 + $0x10] sm:$0xff]  ;;  %v26_v5 = vld [vmem:[%s1312_s1 + $0x8] sm:$0xff]  ;;  %v28_v6 = vld [vmem:[%s1312_s1 + $0x18] sm:$0xff] }
   0x3   :  { %v1072_v8 = vpack.c.bf16 %v125_v4, %v123_v2  ;;  %v833_v9 = vpack.c.bf16 %v28_v6, %v26_v5  ;;  %v25_v10 = vld [vmem:[%s1312_s1] sm:$0xff]  ;;  %v27_v11 = vld [vmem:[%s1312_s1 + $0x10] sm:$0xff]  ;;  %v128_v12 = vld [vmem:[%s1313_s2 + $0x28] sm:$0xff] }
   0x4   :  { %842 = vmatprep.subr.bf16.mxu1 %v1059_v3  ;;  %v835_v13 = vpack.c.bf16 %v27_v11, %v25_v10  ;;  %v130_v14 = vld [vmem:[%s1313_s2 + $0x38] sm:$0xff]  ;;  %v127_v15 = vld [vmem:[%s1313_s2 + $0x20] sm:$0xff]  ;;  %v129_v16 = vld [vmem:[%s1313_s2 + $0x30] sm:$0xff] }
   0x5   :  { %844 = vmatpush1.bf16.msra.mxu1 %v1072_v8  ;;  %834 = vmatprep.subr.bf16.mxu0 %v833_v9  ;;  %v1094_v17 = vpack.c.bf16 %v130_v14, %v128_v12  ;;  %v1096_v18 = vpack.c.bf16 %v129_v16, %v127_v15  ;;  %v30_v19 = vld [vmem:[%s1312_s1 + $0x28] sm:$0xff]  ;;  %v32_v20 = vld [vmem:[%s1312_s1 + $0x38] sm:$0xff]  ;;  %v29_v21 = vld [vmem:[%s1312_s1 + $0x20] sm:$0xff] }
   0x6   :  { %836 = vmatpush1.bf16.msra.mxu0 %v835_v13  ;;  %v837_v22 = vpack.c.bf16 %v32_v20, %v30_v19  ;;  %v31_v23 = vld [vmem:[%s1312_s1 + $0x30] sm:$0xff]  ;;  %v132_v24 = vld [vmem:[%s1313_s2 + $0x48] sm:$0xff]  ;;  %v134_v25 = vld [vmem:[%s1313_s2 + $0x58] sm:$0xff] }
   0x7   :  { %846 = vmatprep.subr.bf16.mxu1 %v1094_v17  ;;  %v839_v26 = vpack.c.bf16 %v31_v23, %v29_v21  ;;  %v1117_v27 = vpack.c.bf16 %v134_v25, %v132_v24  ;;  %v131_v28 = vld [vmem:[%s1313_s2 + $0x40] sm:$0xff]  ;;  %v133_v29 = vld [vmem:[%s1313_s2 + $0x50] sm:$0xff]  ;;  %v136_v30 = vld [vmem:[%s1313_s2 + $0x68] sm:$0xff] }
   0x8   :  { %838 = vmatprep.subr.bf16.mxu0 %v837_v22  ;;  %v138_v31 = vld [vmem:[%s1313_s2 + $0x78] sm:$0xff]  ;;  %v1132_v32 = vpack.c.bf16 %v133_v29, %v131_v28 }
   0x9   :  { %848 = vmatpush1.bf16.msra.mxu1 %v1096_v18 }
   0xa   :  { %11 = vsyncpa [#allocation3], 0  ;;  %840 = vmatpush1.bf16.msra.mxu0 %v839_v26  ;;  %850 = vmatprep.subr.bf16.mxu1 %v1117_v27  ;;  %v24_v33 = vld [vmem:[%s1311_s0] sm:$0xff]  ;;  %vm45_vm0 = vcmask 261120   ;;  %v1138_v34 = vpack.c.bf16 %v138_v31, %v136_v30  ;;  %v137_v36 = vld [vmem:[%s1313_s2 + $0x70] sm:$0xff]  ;;  %v35_v38 = vlaneseq  ;;  %s1010_s22 = smov 96  }
   0xb   :  { %v135_v35 = vld [vmem:[%s1313_s2 + $0x60] sm:$0xff]  ;;  %858 = vmatprep.subr.bf16.mxu0 %v1059_v3  ;;  %s1011_s23 = smov 32   ;;  %vm139_vm1 = vcmask 523264   ;;  %vm1013_vm2 = vmmov 0   ;;  %vm668_vm3 = vcmask 1041408   ;;  %vm670_vm4 = vcmask 1043456  }
   0xc   :  { %v1149_v37 = vpack.c.bf16 %v137_v36, %v135_v35  ;;  %v36_v39 = vshrl.u32 %v35_v38, 7  ;;  %v33_v41 = vld [vmem:[%s1314_s3] sm:$0x3]  ;;  %s1009_s3 = smov 64   ;;  %vm672_vm5 = vcmask 1045504   ;;  %vm762_vm6 = vcmask 130048  }
   0xd   :  { %852 = vmatpush1.bf16.msra.mxu1 %v1132_v32  ;;  %791 = vmatmul.mubr.msk.f32.vlgmr.msra.gmra.mrb[0].mxu0 %vm45_vm0, %v24_v33 }
   0xe   :  { %854 = vmatprep.subr.bf16.mxu1 %v1138_v34  ;;  %860 = vmatpush1.bf16.msra.mxu0 %v1072_v8  ;;  %v41_v40 = vsub.s32 1, %v36_v39  ;;  %v37_v42 = vsub.s32 0, %v36_v39 }
   0xf   :  { %862 = vmatprep.subr.bf16.mxu0 %v1094_v17  ;;  %330 = vmatprep.mubr.f32.mxu0 %v1008_v7 }
  0x10   :  { %v42_v43 = vrot.slane %v33_v41, %v41_v40  ;;  %v38_v46 = vrot.slane %v33_v41, %v37_v42 }
  0x11   :  { %856 = vmatpush1.bf16.msra.mxu1 %v1149_v37 }
  0x12   :  { %864 = vmatpush1.bf16.msra.mxu0 %v1096_v18  ;;  %874 = vmatprep.subr.bf16.mxu1 %v1059_v3 }
  0x13   :  { %866 = vmatprep.subr.bf16.mxu0 %v1117_v27 }
  0x14   :  { %208 = vmatmul.mubr.f32.vlgmr.msra.gmra.mrb[0].mxu1 %v1008_v7 }
  0x15   :  { %876 = vmatpush1.bf16.msra.mxu1 %v1072_v8  ;;  %461 = vmatprep.mubr.f32.mxu1 %v1008_v7 }
  0x16   :  { %868 = vmatpush1.bf16.msra.mxu0 %v1132_v32  ;;  %878 = vmatprep.subr.bf16.mxu1 %v1094_v17 }
  0x17   :  { %870 = vmatprep.subr.bf16.mxu0 %v1138_v34 }
  0x19   :  { %880 = vmatpush1.bf16.msra.mxu1 %v1096_v18 }
  0x1a   :  { %872 = vmatpush1.bf16.msra.mxu0 %v1149_v37  ;;  %882 = vmatprep.subr.bf16.mxu1 %v1117_v27 }
  0x1b   :  { %890 = vmatprep.subr.bf16.mxu0 %v1059_v3 }
  0x1d   :  { %884 = vmatpush1.bf16.msra.mxu1 %v1132_v32 }
  0x1e   :  { %886 = vmatprep.subr.bf16.mxu1 %v1138_v34 }
  0x21   :  { %888 = vmatpush1.bf16.msra.mxu1 %v1149_v37 }
  0xe0   :  { %v115_v44 = vpop.f32.mrb[0].mxu0 }
  0xe1   :  { %v117_v45 = vpop.f32.mrb[1].mxu0  ;;  %v1178_v49 = vadd.f32 %v115_v44, %v38_v46 }
  0xe2   :  { %v1175_v47 = vadd.f32 %v117_v45, %v42_v43 }
  0xe4   :  { %v121_v48 = vrot.slane %v1175_v47, 6  ;;  %v261_v22 = vrot.slane %v1175_v47, 2  ;;  %v675_v47 = vld [vmem:[%s1315_s4 + $0x8] sm:$0xff] }
  0xe7   :  { %v209_v50 = vpop.f32.mrb[0].mxu1 }
  0xe8   :  { %v214_v51 = vadd.f32 %v209_v50, %v1178_v49  ;;  %v211_v52 = vpop.f32.mrb[1].mxu1 }
  0xe9   :  { %v215_v53 = vadd.f32 %v211_v52, %v121_v48 }
  0xea   :  { %v792_v54 = vmul.f32 -1.442695, %v214_v51  ;;  %924 = vtanh.f32 %v214_v51 }
  0xeb   :  { %v793_v55 = vmul.f32 -1.442695, %v215_v53 }
  0xec   :  { %926 = vpow2.f32 %v792_v54 }
  0xed   :  { %928 = vpow2.f32 %v793_v55 }
  0xee   :  { %930 = vtanh.f32 %v215_v53 }
  0xf4   :  { %v925_v56 = vpop.eup %924 }
  0xf5   :  { %241 = vrot.lane.b32.xlu1 %v925_v56, %s1009_s3 }
  0xf6   :  { %v927_v57 = vpop.eup %926 }
  0xf7   :  { %v929_v58 = vpop.eup %928  ;;  %v222_v61 = vadd.f32 1.0, %v927_v57 }
  0xf8   :  { %v931_v59 = vpop.eup %930  ;;  %v223_v60 = vadd.f32 1.0, %v929_v58 }
  0xf9   :  { %245 = vrot.lane.b32.xlu1 %v931_v59, %s1010_s22 }
  0xfa   :  { %932 = vrcp.f32 %v223_v60 }
  0xfb   :  { %934 = vrcp.f32 %v222_v61 }
 0x104   :  { %v933_v62 = vpop.eup %932 }
 0x105   :  { %231 = vrot.lane.b32.xlu0 %v933_v62, %s1011_s23  ;;  %252 = vrot.lane.b32.xlu1 %v933_v62, %s1009_s3  ;;  %v935_v63 = vpop.eup %934 }
 0x109   :  { %236 = vrot.lane.b32.xlu0 %v935_v63, %s1010_s22 }
 0x10d   :  { %249 = vrot.lane.b32.xlu0 %v935_v63, %s1011_s23 }
 0x167   :  { %v242_v0 = vpop.permute.xlu1 %241 }
 0x16b   :  { %v246_v2 = vpop.permute.xlu1 %245 }
 0x16c   :  { %v248_v5 = vsel %vm45_vm0, %v242_v0, %v246_v2 }
 0x177   :  { %v232_v1 = vpop.permute.xlu0 %231  ;;  %v253_v13 = vpop.permute.xlu1 %252 }
 0x178   :  { %v234_v3 = vsel %vm45_vm0, %v935_v63, %v232_v1 }
 0x179   :  { %v257_v9 = vmul.f32 %v248_v5, %v234_v3 }
 0x17b   :  { %v237_v4 = vpop.permute.xlu0 %236 }
 0x17c   :  { %v239_v6 = vsel %vm45_vm0, %v237_v4, %v933_v62 }
 0x17d   :  { %v256_v10 = vmul.f32 0.0, %v239_v6 }
 0x17f   :  { %v258_v11 = vadd.f32 %v257_v9, %v256_v10  ;;  %v250_v12 = vpop.permute.xlu0 %249 }
 0x180   :  { %v255_v15 = vsel %vm45_vm0, %v250_v12, %v253_v13 }
 0x181   :  { %936 = vtanh.f32 %v258_v11 }
 0x18b   :  { %v937_v14 = vpop.eup %936 }
 0x18c   :  { %v1193_v16 = vmul.f32 %v937_v14, %v255_v15 }
 0x18e   :  { %794 = vmatmul.mubr.msk.f32.vlgmr.msra.gmra.mrb[2].mxu0 %vm139_vm1, %v1193_v16 }
 0x18f   :  { %892 = vmatpush1.bf16.msra.mxu0 %v1072_v8  ;;  %592 = vmatprep.mubr.f32.mxu0 %v1008_v7 }
 0x190   :  { %894 = vmatprep.subr.bf16.mxu0 %v1094_v17 }
 0x193   :  { %896 = vmatpush1.bf16.msra.mxu0 %v1096_v18 }
 0x194   :  { %898 = vmatprep.subr.bf16.mxu0 %v1117_v27 }
 0x197   :  { %900 = vmatpush1.bf16.msra.mxu0 %v1132_v32 }
 0x198   :  { %902 = vmatprep.subr.bf16.mxu0 %v1138_v34 }
 0x19b   :  { %904 = vmatpush1.bf16.msra.mxu0 %v1149_v37  ;;  %v386_v37 = vrot.slane %v258_v11, 6 }
 0x261   :  { %v332_v19 = vpop.f32.mrb[2].mxu0 }
 0x262   :  { %v339_v20 = vrot.slane %v332_v19, 6  ;;  %v334_v21 = vpop.f32.mrb[3].mxu0 }
 0x263   :  { %v340_v8 = vrot.slane %v334_v21, 6 }
 0x264   :  { %v343_v23 = vadd.f32 %v339_v20, %v1178_v49 }
 0x265   :  { %v344_v17 = vadd.f32 %v340_v8, %v261_v22 }
 0x266   :  { %v795_v18 = vmul.f32 -1.442695, %v343_v23 }
 0x267   :  { %v796_v24 = vmul.f32 -1.442695, %v344_v17 }
 0x268   :  { %938 = vpow2.f32 %v795_v18 }
 0x269   :  { %940 = vpow2.f32 %v796_v24 }
 0x272   :  { %v939_v25 = vpop.eup %938 }
 0x273   :  { %v941_v26 = vpop.eup %940  ;;  %v351_v27 = vadd.f32 1.0, %v939_v25 }
 0x274   :  { %v352_v28 = vadd.f32 1.0, %v941_v26 }
 0x275   :  { %942 = vrcp.f32 %v351_v27 }
 0x276   :  { %944 = vrcp.f32 %v352_v28 }
 0x277   :  { %946 = vtanh.f32 %v344_v17 }
 0x278   :  { %948 = vtanh.f32 %v343_v23 }
 0x27f   :  { %v943_v29 = vpop.eup %942 }
 0x280   :  { %v945_v30 = vpop.eup %944  ;;  %365 = vrot.lane.b32.xlu1 %v943_v29, %s1010_s22 }
 0x281   :  { %360 = vrot.lane.b32.xlu0 %v945_v30, %s1011_s23  ;;  %v947_v31 = vpop.eup %946 }
 0x282   :  { %v949_v32 = vpop.eup %948 }
 0x284   :  { %374 = vrot.lane.b32.xlu1 %v947_v31, %s1010_s22 }
 0x285   :  { %370 = vrot.lane.b32.xlu0 %v949_v32, %s1009_s3 }
 0x288   :  { %381 = vrot.lane.b32.xlu1 %v945_v30, %s1009_s3 }
 0x289   :  { %378 = vrot.lane.b32.xlu0 %v943_v29, %s1011_s23 }
 0x2f2   :  { %v366_v33 = vpop.permute.xlu1 %365 }
 0x2f3   :  { %v361_v34 = vpop.permute.xlu0 %360  ;;  %v368_v35 = vsel %vm45_vm0, %v366_v33, %v945_v30 }
 0x2f4   :  { %v363_v39 = vsel %vm45_vm0, %v943_v29, %v361_v34  ;;  %v388_v41 = vmul.f32 %v386_v37, %v368_v35 }
 0x2f6   :  { %v375_v36 = vpop.permute.xlu1 %374 }
 0x2f7   :  { %v371_v38 = vpop.permute.xlu0 %370 }
 0x2f8   :  { %v377_v40 = vsel %vm45_vm0, %v371_v38, %v375_v36  ;;  %v674_v36 = vld [vmem:[%s1315_s4] sm:$0xff]  ;;  %v1012_v38 = vmov 0.0|0.0  }
 0x2f9   :  { %v389_v42 = vmul.f32 %v377_v40, %v363_v39  ;;  %905 = vmatprep.subr.bf16.mxu1 %v1012_v38  ;;  %v676_v39 = vld [vmem:[%s1315_s4 + $0x10] sm:$0xff]  ;;  %v677_v40 = vld [vmem:[%s1315_s4 + $0x18] sm:$0xff] }
 0x2fa   :  { %v382_v44 = vpop.permute.xlu1 %381 }
 0x2fb   :  { %v390_v43 = vadd.f32 %v389_v42, %v388_v41  ;;  %v379_v45 = vpop.permute.xlu0 %378  ;;  %v909_v42 = vpack.c.bf16 %v677_v40, %v676_v39 }
 0x2fc   :  { %v384_v50 = vsel %vm45_vm0, %v379_v45, %v382_v44  ;;  %v678_v44 = vld [vmem:[%s1315_s4 + $0x20] sm:$0xff]  ;;  %v679_v45 = vld [vmem:[%s1315_s4 + $0x28] sm:$0xff] }
 0x2fd   :  { %950 = vtanh.f32 %v390_v43  ;;  %v517_v10 = vrot.slane %v390_v43, 6 }
 0x307   :  { %v951_v46 = vpop.eup %950 }
 0x308   :  { %v1219_v51 = vmul.f32 %v951_v46, %v384_v50  ;;  %v912_v46 = vpack.c.bf16 %v679_v45, %v678_v44  ;;  %v680_v50 = vld [vmem:[%s1315_s4 + $0x30] sm:$0xff] }
 0x30a   :  { %v394_v52 = vrot.slane %v1219_v51, 2 }
 0x30c   :  { %797 = vmatmul.mubr.msk.f32.vlgmr.msra.gmra.mrb[2].mxu1 %vm139_vm1, %v394_v52  ;;  %v681_v52 = vld [vmem:[%s1315_s4 + $0x38] sm:$0xff] }
 0x30d   :  { %830 = vmatprep.mubr.msk.f32.mxu1 %vm1013_vm2, %v1008_v7 }
 0x3df   :  { %v463_v53 = vpop.f32.mrb[2].mxu1 }
 0x3e0   :  { %v470_v54 = vrot.slane %v463_v53, 4  ;;  %v465_v55 = vpop.f32.mrb[3].mxu1  ;;  %v915_v53 = vpack.c.bf16 %v681_v52, %v680_v50 }
 0x3e1   :  { %v471_v56 = vrot.slane %v465_v55, 4 }
 0x3e2   :  { %v474_v57 = vadd.f32 %v470_v54, %v1178_v49 }
 0x3e3   :  { %v475_v58 = vadd.f32 %v471_v56, %v121_v48 }
 0x3e4   :  { %v798_v59 = vmul.f32 -1.442695, %v474_v57 }
 0x3e5   :  { %v799_v60 = vmul.f32 -1.442695, %v475_v58 }
 0x3e6   :  { %952 = vpow2.f32 %v798_v59 }
 0x3e7   :  { %954 = vpow2.f32 %v799_v60 }
 0x3f0   :  { %v953_v61 = vpop.eup %952 }
 0x3f1   :  { %v955_v62 = vpop.eup %954  ;;  %v482_v63 = vadd.f32 1.0, %v953_v61 }
 0x3f2   :  { %v483_v0 = vadd.f32 1.0, %v955_v62 }
 0x3f3   :  { %956 = vrcp.f32 %v482_v63 }
 0x3f4   :  { %958 = vrcp.f32 %v483_v0 }
 0x3f5   :  { %960 = vtanh.f32 %v475_v58 }
 0x3f6   :  { %962 = vtanh.f32 %v474_v57 }
 0x3fd   :  { %v957_v1 = vpop.eup %956 }
 0x3fe   :  { %v959_v2 = vpop.eup %958  ;;  %496 = vrot.lane.b32.xlu1 %v957_v1, %s1010_s22 }
 0x3ff   :  { %491 = vrot.lane.b32.xlu0 %v959_v2, %s1011_s23  ;;  %v961_v3 = vpop.eup %960 }
 0x400   :  { %v963_v48 = vpop.eup %962 }
 0x402   :  { %505 = vrot.lane.b32.xlu1 %v961_v3, %s1010_s22 }
 0x403   :  { %501 = vrot.lane.b32.xlu0 %v963_v48, %s1009_s3 }
 0x406   :  { %512 = vrot.lane.b32.xlu1 %v959_v2, %s1009_s3 }
 0x407   :  { %509 = vrot.lane.b32.xlu0 %v957_v1, %s1011_s23 }
 0x470   :  { %v497_v4 = vpop.permute.xlu1 %496 }
 0x471   :  { %v492_v5 = vpop.permute.xlu0 %491  ;;  %v499_v6 = vsel %vm45_vm0, %v497_v4, %v959_v2 }
 0x472   :  { %v494_v12 = vsel %vm45_vm0, %v957_v1, %v492_v5  ;;  %v519_v14 = vmul.f32 %v517_v10, %v499_v6  ;;  %v662_v6 = vrot.slane %v1219_v51, 6 }
 0x474   :  { %v506_v9 = vpop.permute.xlu1 %505 }
 0x475   :  { %v502_v11 = vpop.permute.xlu0 %501 }
 0x476   :  { %v508_v13 = vsel %vm45_vm0, %v502_v11, %v506_v9  ;;  %v665_v9 = vrot.slane %v1193_v16, 2 }
 0x477   :  { %v520_v15 = vmul.f32 %v508_v13, %v494_v12 }
 0x478   :  { %v513_v20 = vpop.permute.xlu1 %512 }
 0x479   :  { %v1235_v19 = vadd.f32 %v520_v15, %v519_v14  ;;  %v510_v21 = vpop.permute.xlu0 %509 }
 0x47a   :  { %v515_v23 = vsel %vm45_vm0, %v510_v21, %v513_v20  ;;  %v803_v20 = vld [vmem:[%s1316_s5] ss:$0 sm:$0xff]  ;;  %s1014_s5 = smov [#allocation2]  }
 0x47b   :  { %964 = vtanh.f32 %v1235_v19  ;;  %v648_v58 = vrot.slane %v1235_v19, 6  ;;  %s783_s16 = sshll.u32 %s1014_s5, 4  ;;  %s784_s16 = int_to_ptr.vmem [resolvable:$true] %s783_s16 }
 0x47c   :  { %s984_s17 = scalar_lea.vmem %s784_s16, 128  ;;  %p989_p1 = scmp.lt.s32.totalorder %s784_s16, %s784_s16 }
 0x47d   :  { %p985_p0 = scmp.ne.s32.totalorder %s784_s16, %s984_s17  ;;  %p990_p2 = scmp.lt.s32.totalorder %s984_s17, %s984_s17 }
 0x47f   :  { %p991_p3 = por %p990_p2, %p989_p1 }
 0x481   :  { %p992_p4 = pnand %p991_p3, %p985_p0 }
 0x485   :  { %v965_v8 = vpop.eup %964 }
 0x486   :  { %v1239_v17 = vmul.f32 %v965_v8, %v515_v23 }
 0x488   :  { %v525_v18 = vrot.slane %v1239_v17, 4  ;;  %v659_v48 = vrot.slane %v1239_v17, 2  ;;  %v664_v12 = vsel %vm45_vm0, %v1239_v17, %v662_v6 }
 0x48a   :  { %800 = vmatmul.mubr.msk.f32.vlgmr.msra.gmra.mrb[4].mxu0 %vm139_vm1, %v525_v18  ;;  %v661_v10 = vsel %vm45_vm0, %v1219_v51, %v659_v48 }
 0x55d   :  { %v594_v24 = vpop.f32.mrb[4].mxu0 }
 0x55e   :  { %v601_v25 = vrot.slane %v594_v24, 2  ;;  %v596_v26 = vpop.f32.mrb[5].mxu0 }
 0x55f   :  { %v602_v27 = vrot.slane %v596_v26, 2 }
 0x560   :  { %v605_v28 = vadd.f32 %v601_v25, %v1178_v49 }
 0x561   :  { %v606_v29 = vadd.f32 %v602_v27, %v261_v22  ;;  %v906_v22 = vpack.c.bf16 %v675_v47, %v674_v36 }
 0x562   :  { %v801_v30 = vmul.f32 -1.442695, %v605_v28 }
 0x563   :  { %v802_v31 = vmul.f32 -1.442695, %v606_v29  ;;  %907 = vmatpush3.bf16.msra.mxu1 %v906_v22 }
 0x564   :  { %966 = vpow2.f32 %v801_v30  ;;  %908 = vmatprep.subr.bf16.mxu1 %v1012_v38 }
 0x565   :  { %968 = vpow2.f32 %v802_v31 }
 0x567   :  { %910 = vmatpush3.bf16.msra.mxu1 %v909_v42 }
 0x568   :  { %911 = vmatprep.subr.bf16.mxu1 %v1012_v38 }
 0x56b   :  { %913 = vmatpush3.bf16.msra.mxu1 %v912_v46 }
 0x56c   :  { %914 = vmatprep.subr.bf16.mxu1 %v1012_v38 }
 0x56e   :  { %v967_v32 = vpop.eup %966 }
 0x56f   :  { %v969_v33 = vpop.eup %968  ;;  %v613_v34 = vadd.f32 1.0, %v967_v32  ;;  %916 = vmatpush3.bf16.msra.mxu1 %v915_v53 }
 0x570   :  { %v614_v35 = vadd.f32 1.0, %v969_v33 }
 0x571   :  { %970 = vrcp.f32 %v613_v34 }
 0x572   :  { %972 = vrcp.f32 %v614_v35 }
 0x573   :  { %974 = vtanh.f32 %v606_v29 }
 0x574   :  { %976 = vtanh.f32 %v605_v28 }
 0x57b   :  { %v971_v49 = vpop.eup %970 }
 0x57c   :  { %v973_v37 = vpop.eup %972  ;;  %627 = vrot.lane.b32.xlu1 %v971_v49, %s1010_s22 }
 0x57d   :  { %622 = vrot.lane.b32.xlu0 %v973_v37, %s1011_s23  ;;  %v975_v41 = vpop.eup %974 }
 0x57e   :  { %v977_v43 = vpop.eup %976 }
 0x580   :  { %636 = vrot.lane.b32.xlu1 %v975_v41, %s1010_s22 }
 0x581   :  { %632 = vrot.lane.b32.xlu0 %v977_v43, %s1009_s3 }
 0x584   :  { %643 = vrot.lane.b32.xlu1 %v973_v37, %s1009_s3 }
 0x585   :  { %640 = vrot.lane.b32.xlu0 %v971_v49, %s1011_s23 }
 0x5ee   :  { %v628_v54 = vpop.permute.xlu1 %627 }
 0x5ef   :  { %v623_v55 = vpop.permute.xlu0 %622  ;;  %v630_v56 = vsel %vm45_vm0, %v628_v54, %v973_v37 }
 0x5f0   :  { %v625_v60 = vsel %vm45_vm0, %v971_v49, %v623_v55  ;;  %v650_v62 = vmul.f32 %v648_v58, %v630_v56 }
 0x5f2   :  { %v637_v57 = vpop.permute.xlu1 %636 }
 0x5f3   :  { %v633_v59 = vpop.permute.xlu0 %632 }
 0x5f4   :  { %v639_v61 = vsel %vm45_vm0, %v633_v59, %v637_v57 }
 0x5f5   :  { %v651_v63 = vmul.f32 %v639_v61, %v625_v60 }
 0x5f6   :  { %v644_v1 = vpop.permute.xlu1 %643 }
 0x5f7   :  { %v652_v0 = vadd.f32 %v651_v63, %v650_v62  ;;  %v641_v2 = vpop.permute.xlu0 %640 }
 0x5f8   :  { %v646_v7 = vsel %vm45_vm0, %v641_v2, %v644_v1 }
 0x5f9   :  { %978 = vtanh.f32 %v652_v0 }
 0x603   :  { %v979_v3 = vpop.eup %978 }
 0x604   :  { %v654_v4 = vmul.f32 %v979_v3, %v646_v7 }
 0x606   :  { %v656_v5 = vrot.slane %v654_v4, 6  ;;  %v667_v14 = vsel %vm45_vm0, %v654_v4, %v665_v9 }
 0x608   :  { %v658_v11 = vsel %vm45_vm0, %v1193_v16, %v656_v5 }
 0x609   :  { %v669_v13 = vsel %vm668_vm3, %v658_v11, %v661_v10 }
 0x60a   :  { %v671_v15 = vsel %vm670_vm4, %v669_v13, %v664_v12 }
 0x60b   :  { %v673_v19 = vsel %vm672_vm5, %v671_v15, %v667_v14 }
 0x60c   :  { %831 = vmatmul.mubr.msk.f32.vlgmr.msra.gmra.mrb[4].mxu1 %vm139_vm1, %v673_v19 }
 0x6df   :  { %v758_v21 = vpop.f32.mrb[4].mxu1 }
 0x6e0   :  { %v759_v51 = vadd.f32 %v803_v20, %v758_v21  ;;  %v832_v8 = vpop.f32.mrb[5].mxu1 }
 0x6e2   :  { %v763_v16 = vsel %vm762_vm6, %v759_v51, -inf }
 0x6e3   :  { %764 = vmax.xlane.f32.xlu0 %v763_v16 }
 0x770   :  { %v765_v23 = vpop.xlane.xlu0 %764 }
 0x771   :  { %v766_v17 = vsub.f32 %v759_v51, %v765_v23 }
 0x773   :  { %v767_v18 = vmul.f32 1.442695, %v766_v17 }
 0x775   :  { %980 = vpow2.f32 %v767_v18 }
 0x77f   :  { %v981_v24 = vpop.eup %980 }
 0x780   :  { %v769_v25 = vsel %vm762_vm6, %v981_v24, 0.0 }
 0x781   :  { %770 = vadd.xlane.f32.xlu1 %v769_v25 }
 0x80e   :  { %v771_v26 = vpop.xlane.xlu1 %770 }
 0x80f   :  { %982 = vlog2.f32 %v771_v26 }
 0x819   :  { %v983_v27 = vpop.eup %982 }
 0x81a   :  { %v773_v28 = vmul.f32 0.6931472, %v983_v27 }
 0x81c   :  { %v774_v29 = vadd.f32 %v773_v28, %v765_v23 }
 0x81e   :  { %v775_v30 = vsub.f32 %v759_v51, %v774_v29 }
 0x820   :  { %776 = vst.msk [vmem:[#allocation2] sm:$0xff] %vm762_vm6, %v775_v30 }
 0x821   :  { %995 = shalt.err (!%p992_p4)
}
 0x822   :  { %s996_s20 = scalar_lea.hbm %s1317_s6, 128 }
 0x823   :  { %p997_p5 = scmp.ne.s32.totalorder %s1317_s6, %s996_s20  ;;  %p1000_p6 = scmp.lt.u32.totalorder %s996_s20, %s1317_s6 }
 0x825   :  { %p1002_p7 = pnand %p1000_p6, %p997_p5 }
 0x827   :  { %1005 = shalt.err (!%p1002_p7)
}
 0x828   :  { %786 = dma.vmem_to_hbm [thread:$0]  %s784_s16, 128, %s1317_s6, [#allocation3]  }
 0x829   :  { %1006 = dma.done.wait [#allocation3], 128  }
 0x82a   :  { %1007 = vsyncadd [#allocation3], 4294967168 }
 0x82b   :  { %790 = vsyncpa [#allocation3], 1 }

</bundles_post_ra>
